<compile_context>
chip_gen: v7x
topology: tpu7x:2x2x1
jax: 0.10.0
libtpu: 0.0.40
codegen_flags: <defaults>
</compile_context>

<pallas_src>
import jax
import jax.numpy as jnp
from jax.experimental import pallas as pl
from jax.experimental.pallas import tpu as pltpu


def _round_up(x, m):
    return ((x + m - 1) // m) * m


def qfunction_kernel(obs_ref, act_ref, w1o_ref, w1a_ref, b1_ref,
                     w2_ref, b2_ref, w3_ref, b3_ref, o_ref):
    # hidden layer 1: the torch.cat is fused away by splitting W1:
    #   [obs, act] @ W1 + b1  ==  obs @ W1[:o_dim] + act @ W1[o_dim:] + b1
    h = jnp.dot(obs_ref[...], w1o_ref[...], preferred_element_type=jnp.float32)
    h = h + jnp.dot(act_ref[...], w1a_ref[...], preferred_element_type=jnp.float32)
    h = jnp.maximum(h + b1_ref[...], 0.0)
    # hidden layer 2: Linear + ReLU (MXU, f32 accumulate)
    h = jnp.dot(h, w2_ref[...], preferred_element_type=jnp.float32)
    h = jnp.maximum(h + b2_ref[...], 0.0)
    # output head (out_dim = 1): VPU multiply + cross-lane reduce, MXU stays free.
    q = jnp.sum(h * w3_ref[...], axis=-1, keepdims=True) + b3_ref[0, 0]
    # TODO(synk): at very large batch, write a lane-dense (num_tiles, TM) slab instead
    # of per-tile (TM, 1) masked stores and reshape in the wrapper.
    o_ref[...] = q.astype(o_ref.dtype)


def qfunction_forward(obs, action, params):
    """params = (w1, b1, w2, b2, w3, b3) with w* as [in_features, out_features]."""
    w1, b1, w2, b2, w3, b3 = params
    B, o_dim = obs.shape
    a_dim = action.shape[1]
    h1 = w1.shape[1]
    h2 = w2.shape[1]

    # Split W1 so obs/action go in separately (no concat, no extra HBM traffic).
    w1o = w1[:o_dim]
    w1a = w1[o_dim:]
    w3_row = w3.reshape(1, h2)      # (h2, 1) -> (1, h2) row for the VPU head
    b3_s = b3.reshape(1, 1)         # scalar, lives in SMEM

    # Batch tile: big enough to pipeline at roofline, sublane-aligned (x8).
    # Tiny VMEM footprint even double-buffered, so the same TM is safe on v5e/v6e/v7x.
    TM = 512 if B >= 512 else _round_up(max(B, 1), 8)
    B_pad = _round_up(B, TM)
    if B_pad != B:
        obs = jnp.pad(obs, ((0, B_pad - B), (0, 0)))
        action = jnp.pad(action, ((0, B_pad - B), (0, 0)))
    grid = (B_pad // TM,)

    flops = 2 * B * (o_dim * h1 + a_dim * h1 + h1 * h2 + h2)
    bytes_accessed = 4 * (B * (o_dim + a_dim + 1)
                          + (o_dim + a_dim) * h1 + h1 + h1 * h2 + h2 + h2 + 1)

    batch_blk = lambda i: (i, 0)     # walk the batch axis
    resident = lambda i: (0, 0)      # weights/biases stay pinned in VMEM

    out = pl.pallas_call(
        qfunction_kernel,
        out_shape=jax.ShapeDtypeStruct((B_pad, 1), jnp.float32),
        grid=grid,
        in_specs=[
            pl.BlockSpec((TM, o_dim), batch_blk),
            pl.BlockSpec((TM, a_dim), batch_blk),
            pl.BlockSpec((o_dim, h1), resident),
            pl.BlockSpec((a_dim, h1), resident),
            pl.BlockSpec((1, h1), resident),
            pl.BlockSpec((h1, h2), resident),
            pl.BlockSpec((1, h2), resident),
            pl.BlockSpec((1, h2), resident),
            pl.BlockSpec((1, 1), resident, memory_space=pltpu.MemorySpace.SMEM),
        ],
        out_specs=pl.BlockSpec((TM, 1), batch_blk),
        compiler_params=pltpu.CompilerParams(
            dimension_semantics=("parallel",),        # shards batch tiles across TCs on v7x
            vmem_limit_bytes=32 * 1024 * 1024,        # explicit, safe on v5e/v6e/v7x
        ),
        cost_estimate=pl.CostEstimate(
            flops=flops, transcendentals=0, bytes_accessed=bytes_accessed),
    )(obs, action, w1o, w1a, b1, w2, b2, w3_row, b3_s)

    return out[:B] if B_pad != B else out


def init_linear(key, fan_in, fan_out):
    # deterministic torch-style init: U(-1/sqrt(fan_in), 1/sqrt(fan_in))
    kw, kb = jax.random.split(key)
    bound = 1.0 / jnp.sqrt(jnp.float32(fan_in))
    w = jax.random.uniform(kw, (fan_in, fan_out), jnp.float32, -bound, bound)
    b = jax.random.uniform(kb, (1, fan_out), jnp.float32, -bound, bound)
    return w, b


if __name__ == "__main__":
    # model_config: o_dim=12, a_dim=4, value_hidden_layers=[32, 32] -> layers [16, 32, 32, 1]
    o_dim, a_dim = 12, 4
    hidden = [32, 32]
    batch = 8

    key = jax.random.PRNGKey(0)
    k_obs, k_act, k1, k2, k3 = jax.random.split(key, 5)

    obs = jax.random.normal(k_obs, (batch, o_dim), jnp.float32)
    action = jax.random.normal(k_act, (batch, a_dim), jnp.float32)

    in_dim = o_dim + a_dim
    w1, b1 = init_linear(k1, in_dim, hidden[0])
    w2, b2 = init_linear(k2, hidden[0], hidden[1])
    w3, b3 = init_linear(k3, hidden[1], 1)
    params = (w1, b1, w2, b2, w3, b3)

    q = qfunction_forward(obs, action, params)
    q = jax.block_until_ready(q)

    # pure-JAX reference check (original module semantics: concat -> MLP)
    x = jnp.concatenate([obs, action], axis=-1)
    h = jnp.maximum(x @ w1 + b1, 0.0)
    h = jnp.maximum(h @ w2 + b2, 0.0)
    q_ref = h @ w3 + b3
    assert q.shape == (batch, 1)
    assert jnp.allclose(q, q_ref, atol=1e-5, rtol=1e-5)

    print("KERNEL_OK")
</pallas_src>

<mosaic_0001>
module attributes {stable_mosaic.version = 11 : i64} {
  func.func @qfunction_kernel(%arg0: i32, %arg1: memref<8x12xf32, #tpu.memory_space<vmem>>, %arg2: memref<8x4xf32, #tpu.memory_space<vmem>>, %arg3: memref<12x32xf32, #tpu.memory_space<vmem>>, %arg4: memref<4x32xf32, #tpu.memory_space<vmem>>, %arg5: memref<1x32xf32, #tpu.memory_space<vmem>>, %arg6: memref<32x32xf32, #tpu.memory_space<vmem>>, %arg7: memref<1x32xf32, #tpu.memory_space<vmem>>, %arg8: memref<1x32xf32, #tpu.memory_space<vmem>>, %arg9: memref<1x1xf32, #tpu.memory_space<smem>>, %arg10: memref<8x1xf32, #tpu.memory_space<vmem>>) attributes {dimension_semantics = [#tpu.dimension_semantics<parallel>], iteration_bounds = array<i64: 1>, scalar_prefetch = 0 : i64, scratch_operands = 0 : i64, tpu.core_type = #tpu.core_type<tc>, window_params = [{transform_indices = @transform_0, window_bounds = array<i64: 8, 12>}, {transform_indices = @transform_1, window_bounds = array<i64: 8, 4>}, {pipeline_mode = #tpu.pipeline_mode<synchronous>, transform_indices = @transform_2, window_bounds = array<i64: 12, 32>}, {pipeline_mode = #tpu.pipeline_mode<synchronous>, transform_indices = @transform_3, window_bounds = array<i64: 4, 32>}, {pipeline_mode = #tpu.pipeline_mode<synchronous>, transform_indices = @transform_4, window_bounds = array<i64: 1, 32>}, {pipeline_mode = #tpu.pipeline_mode<synchronous>, transform_indices = @transform_5, window_bounds = array<i64: 32, 32>}, {pipeline_mode = #tpu.pipeline_mode<synchronous>, transform_indices = @transform_6, window_bounds = array<i64: 1, 32>}, {pipeline_mode = #tpu.pipeline_mode<synchronous>, transform_indices = @transform_7, window_bounds = array<i64: 1, 32>}, {transform_indices = @transform_8, window_bounds = array<i64: 1, 1>}, {transform_indices = @transform_9, window_bounds = array<i64: 8, 1>}]} {
    %c0 = arith.constant 0 : index
    %c0_0 = arith.constant 0 : index
    %0 = vector.load %arg1[%c0, %c0_0] : memref<8x12xf32, #tpu.memory_space<vmem>>, vector<8x12xf32>
    %c0_1 = arith.constant 0 : index
    %c0_2 = arith.constant 0 : index
    %1 = vector.load %arg3[%c0_1, %c0_2] : memref<12x32xf32, #tpu.memory_space<vmem>>, vector<12x32xf32>
    %cst = arith.constant dense<0.000000e+00> : vector<8x32xf32>
    %2 = tpu.matmul %0, %1, %cst {dimension_numbers = #tpu.dot_dimension_numbers<[1], [0], [0], [1], [0, 0, 1, 1], [], []>} : vector<8x12xf32>, vector<12x32xf32>, vector<8x32xf32> -> vector<8x32xf32>
    %c0_3 = arith.constant 0 : index
    %c0_4 = arith.constant 0 : index
    %3 = vector.load %arg2[%c0_3, %c0_4] : memref<8x4xf32, #tpu.memory_space<vmem>>, vector<8x4xf32>
    %c0_5 = arith.constant 0 : index
    %c0_6 = arith.constant 0 : index
    %4 = vector.load %arg4[%c0_5, %c0_6] : memref<4x32xf32, #tpu.memory_space<vmem>>, vector<4x32xf32>
    %cst_7 = arith.constant dense<0.000000e+00> : vector<8x32xf32>
    %5 = tpu.matmul %3, %4, %cst_7 {dimension_numbers = #tpu.dot_dimension_numbers<[1], [0], [0], [1], [0, 0, 1, 1], [], []>} : vector<8x4xf32>, vector<4x32xf32>, vector<8x32xf32> -> vector<8x32xf32>
    %6 = arith.addf %2, %5 : vector<8x32xf32>
    %c0_8 = arith.constant 0 : index
    %c0_9 = arith.constant 0 : index
    %7 = vector.load %arg5[%c0_8, %c0_9] : memref<1x32xf32, #tpu.memory_space<vmem>>, vector<1x32xf32>
    %8 = vector.broadcast %7 : vector<1x32xf32> to vector<8x32xf32>
    %9 = arith.addf %6, %8 : vector<8x32xf32>
    %cst_10 = arith.constant 0.000000e+00 : f32
    %10 = vector.broadcast %cst_10 : f32 to vector<8x32xf32>
    %11 = arith.maximumf %9, %10 : vector<8x32xf32>
    %c0_11 = arith.constant 0 : index
    %c0_12 = arith.constant 0 : index
    %12 = vector.load %arg6[%c0_11, %c0_12] : memref<32x32xf32, #tpu.memory_space<vmem>>, vector<32x32xf32>
    %cst_13 = arith.constant dense<0.000000e+00> : vector<8x32xf32>
    %13 = tpu.matmul %11, %12, %cst_13 {dimension_numbers = #tpu.dot_dimension_numbers<[1], [0], [0], [1], [0, 0, 1, 1], [], []>} : vector<8x32xf32>, vector<32x32xf32>, vector<8x32xf32> -> vector<8x32xf32>
    %c0_14 = arith.constant 0 : index
    %c0_15 = arith.constant 0 : index
    %14 = vector.load %arg7[%c0_14, %c0_15] : memref<1x32xf32, #tpu.memory_space<vmem>>, vector<1x32xf32>
    %15 = vector.broadcast %14 : vector<1x32xf32> to vector<8x32xf32>
    %16 = arith.addf %13, %15 : vector<8x32xf32>
    %cst_16 = arith.constant 0.000000e+00 : f32
    %17 = vector.broadcast %cst_16 : f32 to vector<8x32xf32>
    %18 = arith.maximumf %16, %17 : vector<8x32xf32>
    %c0_17 = arith.constant 0 : index
    %c0_18 = arith.constant 0 : index
    %19 = vector.load %arg8[%c0_17, %c0_18] : memref<1x32xf32, #tpu.memory_space<vmem>>, vector<1x32xf32>
    %20 = vector.broadcast %19 : vector<1x32xf32> to vector<8x32xf32>
    %21 = arith.mulf %18, %20 : vector<8x32xf32>
    %cst_19 = arith.constant dense<0.000000e+00> : vector<8xf32>
    %22 = vector.multi_reduction <add>, %21, %cst_19 [1] : vector<8x32xf32> to vector<8xf32>
    %23 = vector.shape_cast %22 : vector<8xf32> to vector<8x1xf32>
    %c0_20 = arith.constant 0 : index
    %c0_21 = arith.constant 0 : index
    %24 = memref.load %arg9[%c0_20, %c0_21] : memref<1x1xf32, #tpu.memory_space<smem>>
    %25 = vector.broadcast %24 : f32 to vector<8x1xf32>
    %26 = arith.addf %23, %25 : vector<8x1xf32>
    %c0_22 = arith.constant 0 : index
    %c0_23 = arith.constant 0 : index
    %27 = vector.load %arg10[%c0_22, %c0_23] : memref<8x1xf32, #tpu.memory_space<vmem>>, vector<8x1xf32>
    tpu.vector_store %arg10[%c0_22, %c0_23], %26 {strides = array<i32>} : memref<8x1xf32, #tpu.memory_space<vmem>>, vector<8x1xf32>,
    return
  }
  func.func @transform_0(%arg0: i32) -> (i32, i32) {
    %c0_i32 = arith.constant 0 : i32
    %c0_i32_0 = arith.constant 0 : i32
    return %arg0, %c0_i32 : i32, i32
  }
  func.func @transform_1(%arg0: i32) -> (i32, i32) {
    %c0_i32 = arith.constant 0 : i32
    %c0_i32_0 = arith.constant 0 : i32
    return %arg0, %c0_i32 : i32, i32
  }
  func.func @transform_2(%arg0: i32) -> (i32, i32) {
    %c0_i32 = arith.constant 0 : i32
    %c0_i32_0 = arith.constant 0 : i32
    %c0_i32_1 = arith.constant 0 : i32
    return %c0_i32, %c0_i32_0 : i32, i32
  }
  func.func @transform_3(%arg0: i32) -> (i32, i32) {
    %c0_i32 = arith.constant 0 : i32
    %c0_i32_0 = arith.constant 0 : i32
    %c0_i32_1 = arith.constant 0 : i32
    return %c0_i32, %c0_i32_0 : i32, i32
  }
  func.func @transform_4(%arg0: i32) -> (i32, i32) {
    %c0_i32 = arith.constant 0 : i32
    %c0_i32_0 = arith.constant 0 : i32
    %c0_i32_1 = arith.constant 0 : i32
    return %c0_i32, %c0_i32_0 : i32, i32
  }
  func.func @transform_5(%arg0: i32) -> (i32, i32) {
    %c0_i32 = arith.constant 0 : i32
    %c0_i32_0 = arith.constant 0 : i32
    %c0_i32_1 = arith.constant 0 : i32
    return %c0_i32, %c0_i32_0 : i32, i32
  }
  func.func @transform_6(%arg0: i32) -> (i32, i32) {
    %c0_i32 = arith.constant 0 : i32
    %c0_i32_0 = arith.constant 0 : i32
    %c0_i32_1 = arith.constant 0 : i32
    return %c0_i32, %c0_i32_0 : i32, i32
  }
  func.func @transform_7(%arg0: i32) -> (i32, i32) {
    %c0_i32 = arith.constant 0 : i32
    %c0_i32_0 = arith.constant 0 : i32
    %c0_i32_1 = arith.constant 0 : i32
    return %c0_i32, %c0_i32_0 : i32, i32
  }
  func.func @transform_8(%arg0: i32) -> (i32, i32) {
    %c0_i32 = arith.constant 0 : i32
    %c0_i32_0 = arith.constant 0 : i32
    %c0_i32_1 = arith.constant 0 : i32
    return %c0_i32, %c0_i32_0 : i32, i32
  }
  func.func @transform_9(%arg0: i32) -> (i32, i32) {
    %c0_i32 = arith.constant 0 : i32
    %c0_i32_0 = arith.constant 0 : i32
    return %arg0, %c0_i32 : i32, i32
  }
}

</mosaic_0001>

<bundles_post_ra>
// kernel: tpu_custom_call.1
= control target key start
LH: loop header
LB: loop body
LE: loop exit
PB: predicated region body
PF: predicated region fallthrough
CT: control target
= control target key end

     0   :  { %15 = vsyncpa [#allocation4], 0  ;;  %s605_s0 = inlined_call_operand.hbm [shape: f32[8,12], index: 0, kind: input, shape index: {}]   ;;  %s606_s1 = inlined_call_operand.vmem [shape: f32[8,4], index: 1, kind: input, shape index: {}]   ;;  %s607_s2 = inlined_call_operand.hbm [shape: f32[12,32], index: 2, kind: input, shape index: {}]   ;;  %s608_s3 = inlined_call_operand.hbm [shape: f32[4,32], index: 3, kind: input, shape index: {}]   ;;  %s609_s4 = inlined_call_operand.vmem [shape: f32[1,32], index: 4, kind: input, shape index: {}]   ;;  %s610_s5 = inlined_call_operand.vmem [shape: f32[32,32], index: 5, kind: input, shape index: {}]   ;;  %s611_s6 = inlined_call_operand.vmem [shape: f32[1,32], index: 6, kind: input, shape index: {}]   ;;  %s612_s7 = inlined_call_operand.vmem [shape: f32[1,32], index: 7, kind: input, shape index: {}]   ;;  %s613_s8 = inlined_call_operand.<no memory space> [shape: f32[1,1], index: 8, kind: input, shape index: {}]   ;;  %s614_s9 = inlined_call_operand.vmem [shape: f32[8,1], index: 9, kind: output, shape index: {}]  }
   0x1   :  { %16 = vsyncpa [#allocation6], 0  ;;  %s477_s30 = smov [#allocation5]   ;;  %s407_s13 = scalar_lea.hbm %s607_s2, 256 }
   0x2   :  { %s34_s10 = sshll.u32 %s477_s30, 4  ;;  %p408_p0 = scmp.ne.s32.totalorder %s607_s2, %s407_s13  ;;  %s35_s10 = int_to_ptr.vmem [resolvable:$true] %s34_s10 }
   0x3   :  { %p411_p1 = scmp.lt.u32.totalorder %s407_s13, %s607_s2 }
   0x5   :  { %p413_p2 = pnand %p411_p1, %p408_p0 }
   0x7   :  { %416 = shalt.err (!%p413_p2)
}
   0x8   :  { %s417_s18 = scalar_lea.vmem %s35_s10, 256  ;;  %p422_p4 = scmp.lt.s32.totalorder %s35_s10, %s35_s10 }
   0x9   :  { %p418_p3 = scmp.ne.s32.totalorder %s35_s10, %s417_s18  ;;  %p423_p5 = scmp.lt.s32.totalorder %s417_s18, %s417_s18 }
   0xb   :  { %p424_p6 = por %p423_p5, %p422_p4 }
   0xd   :  { %p425_p7 = pnand %p424_p6, %p418_p3 }
   0xf   :  { %428 = shalt.err (!%p425_p7)
}
  0x10   :  { %s478_s19 = smov 128   ;;  %s479_s20 = smov 8  }
  0x11   :  { %40 = dma.hbm_to_vmem [thread:$0]  %s607_s2, 256, %s35_s10, [#allocation6], %s478_s19, %s478_s19, %s479_s20  }
  0x12   :  { %s480_s23 = smov [#allocation3]   ;;  %s481_s25 = smov [#allocation7]  }
  0x13   :  { %s23_s24 = sshll.u32 %s480_s23, 4  ;;  %s47_s26 = sshll.u32 %s481_s25, 4  ;;  %s24_s24 = int_to_ptr.vmem [resolvable:$true] %s23_s24  ;;  %s48_s26 = int_to_ptr.vmem [resolvable:$true] %s47_s26 }
  0x14   :  { %s429_s29 = scalar_lea.hbm %s605_s0, 128 }
  0x15   :  { %p430_p8 = scmp.ne.s32.totalorder %s605_s0, %s429_s29  ;;  %p433_p9 = scmp.lt.u32.totalorder %s429_s29, %s605_s0 }
  0x17   :  { %p435_p10 = pnand %p433_p9, %p430_p8 }
  0x19   :  { %438 = shalt.err (!%p435_p10)
}
  0x1a   :  { %s439_s2 = scalar_lea.vmem %s24_s24, 128  ;;  %p444_p12 = scmp.lt.s32.totalorder %s24_s24, %s24_s24 }
  0x1b   :  { %p440_p11 = scmp.ne.s32.totalorder %s24_s24, %s439_s2  ;;  %p445_p13 = scmp.lt.s32.totalorder %s439_s2, %s439_s2 }
  0x1d   :  { %p446_p0 = por %p445_p13, %p444_p12 }
  0x1f   :  { %p447_p1 = pnand %p446_p0, %p440_p11 }
  0x21   :  { %450 = shalt.err (!%p447_p1)
}
  0x22   :  { %26 = dma.hbm_to_vmem [thread:$0]  %s605_s0, 128, %s24_s24, [#allocation4]  }
  0x23   :  { %s451_s17 = scalar_lea.hbm %s608_s3, 64 }
  0x24   :  { %p452_p2 = scmp.ne.s32.totalorder %s608_s3, %s451_s17  ;;  %p455_p3 = scmp.lt.u32.totalorder %s451_s17, %s608_s3 }
  0x26   :  { %p457_p4 = pnand %p455_p3, %p452_p2 }
  0x28   :  { %460 = shalt.err (!%p457_p4)
}
  0x29   :  { %s461_s22 = scalar_lea.vmem %s48_s26, 64  ;;  %p466_p6 = scmp.lt.s32.totalorder %s48_s26, %s48_s26 }
  0x2a   :  { %p462_p5 = scmp.ne.s32.totalorder %s48_s26, %s461_s22  ;;  %p467_p7 = scmp.lt.s32.totalorder %s461_s22, %s461_s22 }
  0x2c   :  { %p468_p8 = por %p467_p7, %p466_p6 }
  0x2e   :  { %p469_p9 = pnand %p468_p8, %p462_p5 }
  0x30   :  { %472 = shalt.err (!%p469_p9)
}
  0x31   :  { %50 = dma.hbm_to_vmem [thread:$0]  %s608_s3, 64, %s48_s26, [#allocation6]  }
  0x32   :  { %473 = dma.done.wait [#allocation4], 128  }
  0x33   :  { %474 = vsyncadd [#allocation4], 4294967168 }
  0x34   :  { %475 = dma.done.wait [#allocation6], 320  }
  0x35   :  { %476 = vsyncadd [#allocation6], 4294966976  ;;  %v482_v0 = vmov 0.0   ;;  %vm483_vm0 = vmmov 0   ;;  %v484_v1 = vmov 0.0|0.0   ;;  %vm79_vm1 = vcmask 1043456  }
  0x36   :  { %365 = vmatprep.subr.mxu1 %v482_v0  ;;  %367 = vmatprep.mubr.msk.f32.mxu1 %vm483_vm0, %v482_v0  ;;  %vm75_vm2 = vcmask 31744   ;;  %v74_v2 = vld [vmem:[#allocation7] sm:$0xf]  ;;  %v73_v3 = vld [vmem:[%s606_s1] sm:$0xff]  ;;  %v71_v4 = vld [vmem:[#allocation5] sm:$0xff]  ;;  %vm485_vm3 = vmmov 1   ;;  %v337_v30 = vstv %s613_s8 }
  0x37   :  { %392 = vmatprep.subr.bf16.mxu0 %v484_v1  ;;  %385 = vmatprep.mubr.msk.f32.mxu0 %vm483_vm0, %v482_v0  ;;  %vm390_vm4 = vmpackc.low %vm79_vm1, %vm485_vm3  ;;  %v72_v5 = vld [vmem:[#allocation5 + $0x8] sm:$0xf]  ;;  %v70_v7 = vld [vmem:[#allocation3] sm:$0xff]  ;;  %vm153_vm5 = vcmask 97280   ;;  %vm250_vm6 = vcmask 261120   ;;  %vm339_vm7 = vcmask 7168  }
  0x38   :  { %366 = vmatpush3.msk.msra.mxu1 %vm79_vm1, %v74_v2  ;;  %v389_v6 = vpack.c.bf16 %v72_v5, %v71_v4  ;;  %v239_v8 = vld [vmem:[%s610_s5] sm:$0xff]  ;;  %v240_v9 = vld [vmem:[%s610_s5 + $0x8] sm:$0xff]  ;;  %v241_v11 = vld [vmem:[%s610_s5 + $0x10] sm:$0xff] }
  0x39   :  { %368 = vmatmul.mubr.msk.f32.vlgmr.msra.gmra.mrb[0].mxu1 %vm75_vm2, %v73_v3  ;;  %388 = vmatprep.subr.bf16.mxu1 %v484_v1  ;;  %v393_v10 = vpack.c.bf16 %v240_v9, %v239_v8  ;;  %v242_v12 = vld [vmem:[%s610_s5 + $0x18] sm:$0xff]  ;;  %v351_v17 = vld [vmem:[%s609_s4] ss:$0 sm:$0xff] }
  0x3a   :  { %374 = vmatprep.mubr.msk.f32.mxu1 %vm483_vm0, %v482_v0  ;;  %391 = vmatpush3.bf16.msk.msra.mxu1 %vm390_vm4, %v389_v6  ;;  %v396_v13 = vpack.c.bf16 %v242_v12, %v241_v11  ;;  %v352_v22 = vld [vmem:[%s611_s6] ss:$0 sm:$0xff] }
  0x3b   :  { %394 = vmatpush3.bf16.msra.mxu0 %v393_v10  ;;  %v354_v26 = vld [vmem:[%s612_s7] ss:$0 sm:$0xff] }
  0x3c   :  { %395 = vmatprep.subr.bf16.mxu0 %v484_v1 }
  0x3d   :  { %375 = vmatmul.mubr.msk.f32.vlgmr.msra.gmra.mrb[2].mxu1 %vm153_vm5, %v70_v7 }
  0x3f   :  { %397 = vmatpush3.bf16.msra.mxu0 %v396_v13 }
 0x10c   :  { %v149_v14 = vpop.f32.mrb[0].mxu1 }
 0x10d   :  { %v369_v15 = vpop.f32.mrb[1].mxu1 }
 0x110   :  { %v226_v16 = vpop.f32.mrb[2].mxu1 }
 0x111   :  { %v227_v18 = vadd.f32 %v226_v16, %v149_v14  ;;  %v376_v19 = vpop.f32.mrb[3].mxu1 }
 0x113   :  { %v237_v20 = vadd.f32 %v351_v17, %v227_v18 }
 0x115   :  { %v238_v21 = vmax.f32 %v237_v20, 0.0 }
 0x117   :  { %386 = vmatmul.mubr.msk.f32.vlgmr.msra.gmra.mrb[0].mxu0 %vm250_vm6, %v238_v21 }
 0x1ea   :  { %v320_v23 = vpop.f32.mrb[0].mxu0 }
 0x1eb   :  { %v321_v24 = vadd.f32 %v352_v22, %v320_v23  ;;  %v387_v25 = vpop.f32.mrb[1].mxu0 }
 0x1ed   :  { %v324_v27 = vmax.f32 %v321_v24, 0.0 }
 0x1ef   :  { %v332_v28 = vmul.f32 %v354_v26, %v324_v27 }
 0x1f1   :  { %v333_v29 = vsel %vm250_vm6, %v332_v28, 0.0 }
 0x1f2   :  { %334 = vadd.xlane.f32.xlu0 %v333_v29 }
 0x27f   :  { %v335_v31 = vpop.xlane.xlu0 %334 }
 0x280   :  { %v338_v32 = vadd.f32 %v337_v30, %v335_v31 }
 0x282   :  { %340 = vst.msk [vmem:[%s614_s9] sm:$0xff] %vm339_vm7, %v338_v32 }
 0x283   :  { %345 = vsyncpa [#allocation4], 1 }
 0x284   :  { %346 = vsyncpa [#allocation6], 1 }

</bundles_post_ra>
